<compile_context>
chip_gen: v7x
topology: tpu7x:2x2x1
jax: 0.10.0
libtpu: 0.0.40
codegen_flags: <defaults>
</compile_context>

<pallas_src>
import jax
import jax.numpy as jnp
import numpy as np
from jax.experimental import pallas as pl
from jax.experimental.pallas import tpu as pltpu

V = 778          # MANO vertex count
NJ = 16          # kinematic joints
NF = 1538        # MANO faces
TIP_IDX = [745, 317, 444, 556, 673]
REORDER_21 = [0, 13, 14, 15, 16, 1, 2, 3, 17, 4, 5, 6, 18,
              10, 11, 12, 19, 7, 8, 9, 20]
REORDER_16 = [0, 1, 6, 11, 2, 7, 12, 3, 8, 13, 4, 9, 14, 5, 10, 15]
LEV1 = [1, 4, 7, 10, 13]
LEV2 = [2, 5, 8, 11, 14]
LEV3 = [3, 6, 9, 12, 15]


# ----------------------------------------------------------------------------
# Pallas kernel: LBS skinning with pre-folded (scale * global-SE3 + trans)
#   w_ref  : (NJ, V)       skin weights, transposed (verts on lanes), shared
#   A_ref  : (3, 4, B, NJ) per-joint folded 3x4 transforms; dim0 = output
#                          component, dim1 = multiplier column (x, y, z, 1)
#   vp_ref : (3, B, V)     posed rest verts, component-major (verts on lanes)
#   out    : (3, B, V)     skinned + globally transformed verts
# ----------------------------------------------------------------------------
def _lbs_kernel(w_ref, A_ref, vp_ref, out_ref):
    wT = w_ref[...]                                   # (NJ, V)
    x = vp_ref[0]                                     # (B, V) full-lane vregs
    y = vp_ref[1]
    z = vp_ref[2]
    for c in range(3):                                # unrolled at trace time
        def t(k):
            # blended per-vertex transform entry (c, k): (B,16)@(16,V), MXU,
            # lane-dense result consumed immediately (no big T round-trip).
            return jnp.dot(A_ref[c, k], wT, preferred_element_type=jnp.float32)
        # 3x4 apply; the translation column t(3) already includes the folded
        # global translation + MANO trans (weights sum to 1).
        out_ref[c] = t(0) * x + t(1) * y + t(2) * z + t(3)


def _round_up(x, m):
    return (x + m - 1) // m * m


def _pick_block(n):
    """Hands per grid step: multiple of 8 (full sublanes), capped at 128, and
    clamped so the grid stays >= 2 when N >= 16 (v7x dual-TC sharding)."""
    if n < 16:
        return _round_up(max(n, 1), 8)     # single (padded) block, tiny batch
    return min(128, _round_up((n + 1) // 2, 8))


def pallas_lbs(weights_T, Ap, vp_t):
    """weights_T (NJ,V), Ap (3,4,N,NJ), vp_t (3,N,V) -> (3,N,V) skinned verts."""
    N = Ap.shape[2]
    B = _pick_block(N)
    # Only tiny batches (N < 16) get padded; for larger N the last block may be
    # ragged and Pallas pads its reads / drops its out-of-bounds writes, so no
    # extra XLA pad/slice passes over the big arrays are needed.
    N_run = max(N, B)
    if N_run != N:
        Ap = jnp.pad(Ap, ((0, 0), (0, 0), (0, N_run - N), (0, 0)))
        vp_t = jnp.pad(vp_t, ((0, 0), (0, N_run - N), (0, 0)))

    verts_t = pl.pallas_call(
        _lbs_kernel,
        out_shape=jax.ShapeDtypeStruct((3, N_run, V), jnp.float32),
        grid=(pl.cdiv(N_run, B),),
        in_specs=[
            pl.BlockSpec((NJ, V), lambda b: (0, 0)),          # skin weights^T (shared)
            pl.BlockSpec((3, 4, B, NJ), lambda b: (0, 0, b, 0)),  # folded 3x4s
            pl.BlockSpec((3, B, V), lambda b: (0, b, 0)),      # posed rest verts
        ],
        out_specs=pl.BlockSpec((3, B, V), lambda b: (0, b, 0)),
        compiler_params=pltpu.CompilerParams(
            dimension_semantics=("parallel",),
            vmem_limit_bytes=32 * 1024 * 1024),
    )(weights_T, Ap, vp_t)
    return verts_t if N_run == N else verts_t[:, :N]


# ----------------------------------------------------------------------------
# JAX glue: Rodrigues, kinematic chain, SE3 parameterization
# ----------------------------------------------------------------------------
def axis_angle_to_matrix(aa):
    """aa: (..., 3) axis-angle -> (..., 3, 3) rotation matrix (Rodrigues)."""
    eps = 1e-8
    angle = jnp.sqrt(jnp.sum(aa * aa, axis=-1, keepdims=True) + eps)
    axis = aa / angle
    x, y, z = axis[..., 0], axis[..., 1], axis[..., 2]
    c = jnp.cos(angle)[..., 0]
    s = jnp.sin(angle)[..., 0]
    C = 1.0 - c
    R = jnp.stack([
        jnp.stack([c + x * x * C, x * y * C - z * s, x * z * C + y * s], -1),
        jnp.stack([y * x * C + z * s, c + y * y * C, y * z * C - x * s], -1),
        jnp.stack([z * x * C - y * s, z * y * C + x * s, c + z * z * C], -1),
    ], axis=-2)
    return R


def se3_to_matrix(se3):
    """se3: (N, 9) = [translation(3), axis-angle rotation(3), scale(3)] -> (N,4,4)."""
    # TODO(synk): exact geom_utils.se3_to_matrix parameterization (6D rot) not
    # available here; axis-angle + translation + per-axis scale used instead.
    t, aa, s = se3[:, :3], se3[:, 3:6], se3[:, 6:9]
    R = axis_angle_to_matrix(aa) * s[:, None, :]
    top = jnp.concatenate([R, t[:, :, None]], axis=2)          # (N,3,4)
    bottom = jnp.broadcast_to(
        jnp.array([0., 0., 0., 1.], jnp.float32), (se3.shape[0], 1, 4))
    return jnp.concatenate([top, bottom], axis=1)               # (N,4,4)


def _with_zeros(x):
    """(N, K, 3, 4) -> (N, K, 4, 4) by appending [0,0,0,1] rows."""
    N, K = x.shape[0], x.shape[1]
    bottom = jnp.broadcast_to(jnp.array([0., 0., 0., 1.], jnp.float32),
                              (N, K, 1, 4))
    return jnp.concatenate([x, bottom], axis=2)


class ManopthWrapperPallas:
    """JAX/Pallas re-implementation of ManopthWrapper.forward (mode='outer').

    Synthetic, deterministic MANO parameters (no .pkl asset loading)."""

    def __init__(self, key, metric=1.0):
        self.metric = metric
        k = jax.random.split(key, 8)
        self.th_v_template = 0.1 * jax.random.normal(k[0], (V, 3), jnp.float32)
        self.th_shapedirs = 0.01 * jax.random.normal(k[1], (V, 3, 10), jnp.float32)
        self.th_betas = jnp.zeros((1, 10), jnp.float32)          # ManoLayer default
        self.th_posedirs = 0.01 * jax.random.normal(k[2], (V, 3, 135), jnp.float32)
        jr = jax.random.uniform(k[3], (NJ, V), jnp.float32)
        self.th_J_regressor = jr / jnp.sum(jr, axis=-1, keepdims=True)
        w = jax.random.uniform(k[4], (V, NJ), jnp.float32)
        # normalized to sum to 1 per vertex: required for the ct-fold in forward()
        self.th_weights = w / jnp.sum(w, axis=-1, keepdims=True)
        self.hand_faces = jax.random.randint(k[5], (1, NF, 3), 0, V).astype(jnp.int32)
        # buffers kept for parity with the torch module (unused in forward):
        self.hand_mean = jnp.zeros((1, 45), jnp.float32)         # flat_hand_mean=True
        self.th_selected_comps = jax.random.normal(k[6], (45, 45), jnp.float32)
        self.inv_scale = 1.0 / jnp.sum(self.th_selected_comps ** 2, axis=-1)
        self.t_mano = jnp.array([[0.09566994, 0.00638343, 0.0061863]], jnp.float32)
        # TODO(synk): contact_zones.pkl contact-index buffers skipped (file asset).

        # --- precomputed, forward-invariant quantities --------------------------
        # lane-dense skin weights: joints on sublanes, 778 verts on lanes
        self.weights_T = jnp.asarray(self.th_weights.T)                     # (NJ, V)
        # shape blend + rest joints depend only on the fixed betas buffer
        v_shaped = (jnp.einsum('vck,k->vc', self.th_shapedirs, self.th_betas[0])
                    + self.th_v_template)                                   # (V, 3)
        self.v_shaped_t = jnp.asarray(v_shaped.T)                           # (3, V)
        self.j_rest = self.th_J_regressor @ v_shaped                        # (NJ, 3)
        # posedirs arranged component-major so the pose-blend matmul produces
        # v_posed directly in the kernel's (3, N, V) layout (no transpose pass).
        self.posedirs_c = jnp.transpose(self.th_posedirs, (1, 2, 0))        # (3,135,V)

    # --- MANO forward pieces (glue) ------------------------------------------------
    def _skinning_inputs(self, full_pose):
        N = full_pose.shape[0]
        rot = axis_angle_to_matrix(full_pose.reshape(N, NJ, 3))          # (N,16,3,3)
        pose_map = (rot[:, 1:] - jnp.eye(3, dtype=jnp.float32)).reshape(N, 135)

        # pose blendshapes directly in (3, N, V): batched matmul with the
        # component axis as a dot batch dim -> output layout is (c, n, v),
        # no glue-side transpose / extra HBM pass before the kernel.
        pose_map_b = jnp.broadcast_to(pose_map[None], (3, N, 135))
        v_posed_t = (jax.lax.dot_general(
            pose_map_b, self.posedirs_c,
            dimension_numbers=(((2,), (1,)), ((0,), (0,))),
            preferred_element_type=jnp.float32)
            + self.v_shaped_t[:, None, :])                               # (3,N,V)
        th_j = jnp.broadcast_to(self.j_rest[None], (N, NJ, 3))           # (N,16,3)

        # kinematic chain
        root_rot = rot[:, 0:1]                                           # (N,1,3,3)
        root_j = th_j[:, 0:1]                                            # (N,1,3)
        root_trans = _with_zeros(
            jnp.concatenate([root_rot, root_j[..., None]], axis=3))      # (N,1,4,4)

        def level(prev_flt, idxs, parent_j):
            rots = rot[:, idxs]                                          # (N,5,3,3)
            j_rel = th_j[:, idxs] - parent_j                             # (N,5,3)
            rel = _with_zeros(jnp.concatenate([rots, j_rel[..., None]], 3))
            return jnp.matmul(prev_flt, rel)                             # (N,5,4,4)

        lev1_flt = level(root_trans, LEV1, root_j)
        lev2_flt = level(lev1_flt, LEV2, th_j[:, LEV1])
        lev3_flt = level(lev2_flt, LEV3, th_j[:, LEV2])
        th_results = jnp.concatenate(
            [root_trans, lev1_flt, lev2_flt, lev3_flt], axis=1)[:, REORDER_16]

        j16 = th_results[:, :, :3, 3]                                    # (N,16,3)
        # translation adjustment: A = G - G @ [j; 0]  (3x4, column-vector conv.)
        Rj = jnp.einsum('nkab,nkb->nka', th_results[:, :, :3, :3], th_j)
        A34 = jnp.concatenate([th_results[:, :, :3, :3],
                               (th_results[:, :, :3, 3] - Rj)[..., None]],
                              axis=-1)                                   # (N,16,3,4)
        return v_posed_t, A34, j16

    def forward(self, glb_se3, art_pose, axisang=None, trans=None):
        N = art_pose.shape[0]
        if axisang is None:
            axisang = jnp.zeros((N, 3), jnp.float32)
        if trans is None:
            trans = jnp.zeros((N, 3), jnp.float32)
        if art_pose.shape[-1] == 45:
            art_pose = jnp.concatenate([axisang, art_pose], axis=-1)     # (N,48)

        vp_t, A34, j16 = self._skinning_inputs(art_pose)                 # vp_t (3,N,V)

        mat_rt = se3_to_matrix(glb_se3)                                  # (N,4,4)
        Rg = mat_rt[:, :3, :3]
        tg = mat_rt[:, :3, 3]
        scale = self.metric / 1000.0                                     # verts /= 1000/metric

        # Fold scale * global rotation into the per-joint 3x4s; fold the MANO
        # trans + global translation into the translation column as well
        # (valid: skin weights are normalized to sum to 1, error ~1e-7).
        A_fold = scale * jnp.einsum('nab,njbk->njak', Rg, A34)           # (N,16,3,4)
        ct = scale * jnp.einsum('nab,nb->na', Rg, trans) + tg            # (N,3)
        A_fold = A_fold.at[..., 3].add(ct[:, None, :])

        # lane-dense kernel layout: (component, multiplier, hand, joint)
        Ap = jnp.transpose(A_fold, (2, 3, 0, 1))                         # (3,4,N,16)

        verts_t = pallas_lbs(self.weights_T, Ap, vp_t)                   # (3,N,V)
        verts = jnp.transpose(verts_t, (1, 2, 0))                        # (N,V,3)

        # 16x3 joint path: trivial, stays in XLA (no extra kernel output DMA)
        joints16 = (jnp.einsum('nab,njb->nja', Rg,
                               (j16 + trans[:, None, :]) * scale)
                    + tg[:, None, :])

        tips = verts[:, jnp.array(TIP_IDX)]                              # (N,5,3)
        joints = jnp.concatenate([joints16, tips], axis=1)[:, jnp.array(REORDER_21)]
        faces = jnp.broadcast_to(self.hand_faces, (N, NF, 3))
        textures = jnp.ones_like(verts)
        # pytorch3d Meshes/TexturesVertex are containers only; return raw tensors
        # (equivalent to the return_mesh=False branch).
        return verts, faces, textures, joints


# ----------------------------------------------------------------------------
# Pure-JAX reference of the un-fused hot path (verifies kernel + folding)
# ----------------------------------------------------------------------------
def _reference_lbs(weights, A34, v_posed, j16, mat_rt, trans, scale):
    T = jnp.einsum('vj,njck->nvck', weights, A34)                        # (N,V,3,4)
    homo = jnp.concatenate(
        [v_posed, jnp.ones(v_posed.shape[:-1] + (1,), jnp.float32)], -1)
    v = jnp.einsum('nvck,nvk->nvc', T, homo)
    v = (v + trans[:, None, :]) * scale
    j = (j16 + trans[:, None, :]) * scale
    Rg, tg = mat_rt[:, :3, :3], mat_rt[:, :3, 3]
    v_out = jnp.einsum('nab,nvb->nva', Rg, v) + tg[:, None, :]
    j_out = jnp.einsum('nab,njb->nja', Rg, j) + tg[:, None, :]
    return v_out, j_out


if __name__ == "__main__":
    key = jax.random.PRNGKey(0)
    k_param, k_pose, k_se3t, k_se3r, k_se3s, k_trans = jax.random.split(key, 6)

    wrapper = ManopthWrapperPallas(k_param, metric=1.0)

    N = 2
    art_pose = 0.1 * jax.random.normal(k_pose, (N, 45), jnp.float32)
    glb_se3 = jnp.concatenate([
        0.1 * jax.random.normal(k_se3t, (N, 3), jnp.float32),            # translation
        0.5 * jax.random.normal(k_se3r, (N, 3), jnp.float32),            # axis-angle rot
        1.0 + 0.1 * jax.random.normal(k_se3s, (N, 3), jnp.float32),      # scale
    ], axis=-1)
    trans = 0.05 * jax.random.normal(k_trans, (N, 3), jnp.float32)

    fwd = jax.jit(wrapper.forward)
    verts, faces, textures, joints = fwd(glb_se3, art_pose, trans=trans)
    jax.block_until_ready((verts, faces, textures, joints))

    # verify fused kernel against the pure-JAX un-fused reference
    full_pose = jnp.concatenate([jnp.zeros((N, 3), jnp.float32), art_pose], -1)
    vp_t, A34, j16 = wrapper._skinning_inputs(full_pose)
    v_posed = jnp.transpose(vp_t, (1, 2, 0))                             # (N,V,3)
    mat_rt = se3_to_matrix(glb_se3)
    v_ref, j_ref = _reference_lbs(wrapper.th_weights, A34, v_posed, j16,
                                  mat_rt, trans, wrapper.metric / 1000.0)
    tips = v_ref[:, jnp.array(TIP_IDX)]
    joints_ref = jnp.concatenate([j_ref, tips], 1)[:, jnp.array(REORDER_21)]

    np.testing.assert_allclose(np.asarray(verts), np.asarray(v_ref),
                               rtol=1e-4, atol=1e-5)
    np.testing.assert_allclose(np.asarray(joints), np.asarray(joints_ref),
                               rtol=1e-4, atol=1e-5)

    assert verts.shape == (N, V, 3) and joints.shape == (N, 21, 3)
    assert faces.shape == (N, NF, 3) and textures.shape == (N, V, 3)
    print("KERNEL_OK")
</pallas_src>

<mosaic_0001>
module attributes {stable_mosaic.version = 11 : i64} {
  func.func @_lbs_kernel(%arg0: i32, %arg1: memref<16x778xf32, #tpu.memory_space<vmem>>, %arg2: memref<3x4x8x16xf32, #tpu.memory_space<vmem>>, %arg3: memref<3x8x778xf32, #tpu.memory_space<vmem>>, %arg4: memref<3x8x778xf32, #tpu.memory_space<vmem>>) attributes {dimension_semantics = [#tpu.dimension_semantics<parallel>], iteration_bounds = array<i64: 1>, scalar_prefetch = 0 : i64, scratch_operands = 0 : i64, tpu.core_type = #tpu.core_type<tc>, window_params = [{pipeline_mode = #tpu.pipeline_mode<synchronous>, transform_indices = @transform_0, window_bounds = array<i64: 16, 778>}, {transform_indices = @transform_1, window_bounds = array<i64: 3, 4, 8, 16>}, {transform_indices = @transform_2, window_bounds = array<i64: 3, 8, 778>}, {transform_indices = @transform_3, window_bounds = array<i64: 3, 8, 778>}]} {
    %c0 = arith.constant 0 : index
    %c0_0 = arith.constant 0 : index
    %0 = vector.load %arg1[%c0, %c0_0] : memref<16x778xf32, #tpu.memory_space<vmem>>, vector<16x778xf32>
    %c0_1 = arith.constant 0 : index
    %c0_2 = arith.constant 0 : index
    %c0_3 = arith.constant 0 : index
    %1 = vector.load %arg3[%c0_1, %c0_2, %c0_3] : memref<3x8x778xf32, #tpu.memory_space<vmem>>, vector<1x8x778xf32>
    %2 = vector.shape_cast %1 : vector<1x8x778xf32> to vector<8x778xf32>
    %c1 = arith.constant 1 : index
    %c0_4 = arith.constant 0 : index
    %c0_5 = arith.constant 0 : index
    %3 = vector.load %arg3[%c1, %c0_4, %c0_5] : memref<3x8x778xf32, #tpu.memory_space<vmem>>, vector<1x8x778xf32>
    %4 = vector.shape_cast %3 : vector<1x8x778xf32> to vector<8x778xf32>
    %c2 = arith.constant 2 : index
    %c0_6 = arith.constant 0 : index
    %c0_7 = arith.constant 0 : index
    %5 = vector.load %arg3[%c2, %c0_6, %c0_7] : memref<3x8x778xf32, #tpu.memory_space<vmem>>, vector<1x8x778xf32>
    %6 = vector.shape_cast %5 : vector<1x8x778xf32> to vector<8x778xf32>
    %c0_8 = arith.constant 0 : index
    %c0_9 = arith.constant 0 : index
    %c0_10 = arith.constant 0 : index
    %c0_11 = arith.constant 0 : index
    %7 = vector.load %arg2[%c0_8, %c0_9, %c0_10, %c0_11] : memref<3x4x8x16xf32, #tpu.memory_space<vmem>>, vector<1x1x8x16xf32>
    %8 = vector.shape_cast %7 : vector<1x1x8x16xf32> to vector<8x16xf32>
    %cst = arith.constant dense<0.000000e+00> : vector<8x778xf32>
    %9 = tpu.matmul %8, %0, %cst {dimension_numbers = #tpu.dot_dimension_numbers<[1], [0], [0], [1], [0, 0, 1, 1], [], []>} : vector<8x16xf32>, vector<16x778xf32>, vector<8x778xf32> -> vector<8x778xf32>
    %10 = arith.mulf %9, %2 : vector<8x778xf32>
    %c0_12 = arith.constant 0 : index
    %c1_13 = arith.constant 1 : index
    %c0_14 = arith.constant 0 : index
    %c0_15 = arith.constant 0 : index
    %11 = vector.load %arg2[%c0_12, %c1_13, %c0_14, %c0_15] : memref<3x4x8x16xf32, #tpu.memory_space<vmem>>, vector<1x1x8x16xf32>
    %12 = vector.shape_cast %11 : vector<1x1x8x16xf32> to vector<8x16xf32>
    %cst_16 = arith.constant dense<0.000000e+00> : vector<8x778xf32>
    %13 = tpu.matmul %12, %0, %cst_16 {dimension_numbers = #tpu.dot_dimension_numbers<[1], [0], [0], [1], [0, 0, 1, 1], [], []>} : vector<8x16xf32>, vector<16x778xf32>, vector<8x778xf32> -> vector<8x778xf32>
    %14 = arith.mulf %13, %4 : vector<8x778xf32>
    %15 = arith.addf %10, %14 : vector<8x778xf32>
    %c0_17 = arith.constant 0 : index
    %c2_18 = arith.constant 2 : index
    %c0_19 = arith.constant 0 : index
    %c0_20 = arith.constant 0 : index
    %16 = vector.load %arg2[%c0_17, %c2_18, %c0_19, %c0_20] : memref<3x4x8x16xf32, #tpu.memory_space<vmem>>, vector<1x1x8x16xf32>
    %17 = vector.shape_cast %16 : vector<1x1x8x16xf32> to vector<8x16xf32>
    %cst_21 = arith.constant dense<0.000000e+00> : vector<8x778xf32>
    %18 = tpu.matmul %17, %0, %cst_21 {dimension_numbers = #tpu.dot_dimension_numbers<[1], [0], [0], [1], [0, 0, 1, 1], [], []>} : vector<8x16xf32>, vector<16x778xf32>, vector<8x778xf32> -> vector<8x778xf32>
    %19 = arith.mulf %18, %6 : vector<8x778xf32>
    %20 = arith.addf %15, %19 : vector<8x778xf32>
    %c0_22 = arith.constant 0 : index
    %c3 = arith.constant 3 : index
    %c0_23 = arith.constant 0 : index
    %c0_24 = arith.constant 0 : index
    %21 = vector.load %arg2[%c0_22, %c3, %c0_23, %c0_24] : memref<3x4x8x16xf32, #tpu.memory_space<vmem>>, vector<1x1x8x16xf32>
    %22 = vector.shape_cast %21 : vector<1x1x8x16xf32> to vector<8x16xf32>
    %cst_25 = arith.constant dense<0.000000e+00> : vector<8x778xf32>
    %23 = tpu.matmul %22, %0, %cst_25 {dimension_numbers = #tpu.dot_dimension_numbers<[1], [0], [0], [1], [0, 0, 1, 1], [], []>} : vector<8x16xf32>, vector<16x778xf32>, vector<8x778xf32> -> vector<8x778xf32>
    %24 = arith.addf %20, %23 : vector<8x778xf32>
    %c0_26 = arith.constant 0 : index
    %c0_27 = arith.constant 0 : index
    %c0_28 = arith.constant 0 : index
    %25 = vector.load %arg4[%c0_26, %c0_27, %c0_28] : memref<3x8x778xf32, #tpu.memory_space<vmem>>, vector<1x8x778xf32>
    %26 = vector.shape_cast %25 : vector<1x8x778xf32> to vector<8x778xf32>
    %27 = vector.shape_cast %24 : vector<8x778xf32> to vector<1x8x778xf32>
    tpu.vector_store %arg4[%c0_26, %c0_27, %c0_28], %27 {strides = array<i32>} : memref<3x8x778xf32, #tpu.memory_space<vmem>>, vector<1x8x778xf32>,
    %c1_29 = arith.constant 1 : index
    %c0_30 = arith.constant 0 : index
    %c0_31 = arith.constant 0 : index
    %c0_32 = arith.constant 0 : index
    %28 = vector.load %arg2[%c1_29, %c0_30, %c0_31, %c0_32] : memref<3x4x8x16xf32, #tpu.memory_space<vmem>>, vector<1x1x8x16xf32>
    %29 = vector.shape_cast %28 : vector<1x1x8x16xf32> to vector<8x16xf32>
    %cst_33 = arith.constant dense<0.000000e+00> : vector<8x778xf32>
    %30 = tpu.matmul %29, %0, %cst_33 {dimension_numbers = #tpu.dot_dimension_numbers<[1], [0], [0], [1], [0, 0, 1, 1], [], []>} : vector<8x16xf32>, vector<16x778xf32>, vector<8x778xf32> -> vector<8x778xf32>
    %31 = arith.mulf %30, %2 : vector<8x778xf32>
    %c1_34 = arith.constant 1 : index
    %c1_35 = arith.constant 1 : index
    %c0_36 = arith.constant 0 : index
    %c0_37 = arith.constant 0 : index
    %32 = vector.load %arg2[%c1_34, %c1_35, %c0_36, %c0_37] : memref<3x4x8x16xf32, #tpu.memory_space<vmem>>, vector<1x1x8x16xf32>
    %33 = vector.shape_cast %32 : vector<1x1x8x16xf32> to vector<8x16xf32>
    %cst_38 = arith.constant dense<0.000000e+00> : vector<8x778xf32>
    %34 = tpu.matmul %33, %0, %cst_38 {dimension_numbers = #tpu.dot_dimension_numbers<[1], [0], [0], [1], [0, 0, 1, 1], [], []>} : vector<8x16xf32>, vector<16x778xf32>, vector<8x778xf32> -> vector<8x778xf32>
    %35 = arith.mulf %34, %4 : vector<8x778xf32>
    %36 = arith.addf %31, %35 : vector<8x778xf32>
    %c1_39 = arith.constant 1 : index
    %c2_40 = arith.constant 2 : index
    %c0_41 = arith.constant 0 : index
    %c0_42 = arith.constant 0 : index
    %37 = vector.load %arg2[%c1_39, %c2_40, %c0_41, %c0_42] : memref<3x4x8x16xf32, #tpu.memory_space<vmem>>, vector<1x1x8x16xf32>
    %38 = vector.shape_cast %37 : vector<1x1x8x16xf32> to vector<8x16xf32>
    %cst_43 = arith.constant dense<0.000000e+00> : vector<8x778xf32>
    %39 = tpu.matmul %38, %0, %cst_43 {dimension_numbers = #tpu.dot_dimension_numbers<[1], [0], [0], [1], [0, 0, 1, 1], [], []>} : vector<8x16xf32>, vector<16x778xf32>, vector<8x778xf32> -> vector<8x778xf32>
    %40 = arith.mulf %39, %6 : vector<8x778xf32>
    %41 = arith.addf %36, %40 : vector<8x778xf32>
    %c1_44 = arith.constant 1 : index
    %c3_45 = arith.constant 3 : index
    %c0_46 = arith.constant 0 : index
    %c0_47 = arith.constant 0 : index
    %42 = vector.load %arg2[%c1_44, %c3_45, %c0_46, %c0_47] : memref<3x4x8x16xf32, #tpu.memory_space<vmem>>, vector<1x1x8x16xf32>
    %43 = vector.shape_cast %42 : vector<1x1x8x16xf32> to vector<8x16xf32>
    %cst_48 = arith.constant dense<0.000000e+00> : vector<8x778xf32>
    %44 = tpu.matmul %43, %0, %cst_48 {dimension_numbers = #tpu.dot_dimension_numbers<[1], [0], [0], [1], [0, 0, 1, 1], [], []>} : vector<8x16xf32>, vector<16x778xf32>, vector<8x778xf32> -> vector<8x778xf32>
    %45 = arith.addf %41, %44 : vector<8x778xf32>
    %c1_49 = arith.constant 1 : index
    %c0_50 = arith.constant 0 : index
    %c0_51 = arith.constant 0 : index
    %46 = vector.load %arg4[%c1_49, %c0_50, %c0_51] : memref<3x8x778xf32, #tpu.memory_space<vmem>>, vector<1x8x778xf32>
    %47 = vector.shape_cast %46 : vector<1x8x778xf32> to vector<8x778xf32>
    %48 = vector.shape_cast %45 : vector<8x778xf32> to vector<1x8x778xf32>
    tpu.vector_store %arg4[%c1_49, %c0_50, %c0_51], %48 {strides = array<i32>} : memref<3x8x778xf32, #tpu.memory_space<vmem>>, vector<1x8x778xf32>,
    %c2_52 = arith.constant 2 : index
    %c0_53 = arith.constant 0 : index
    %c0_54 = arith.constant 0 : index
    %c0_55 = arith.constant 0 : index
    %49 = vector.load %arg2[%c2_52, %c0_53, %c0_54, %c0_55] : memref<3x4x8x16xf32, #tpu.memory_space<vmem>>, vector<1x1x8x16xf32>
    %50 = vector.shape_cast %49 : vector<1x1x8x16xf32> to vector<8x16xf32>
    %cst_56 = arith.constant dense<0.000000e+00> : vector<8x778xf32>
    %51 = tpu.matmul %50, %0, %cst_56 {dimension_numbers = #tpu.dot_dimension_numbers<[1], [0], [0], [1], [0, 0, 1, 1], [], []>} : vector<8x16xf32>, vector<16x778xf32>, vector<8x778xf32> -> vector<8x778xf32>
    %52 = arith.mulf %51, %2 : vector<8x778xf32>
    %c2_57 = arith.constant 2 : index
    %c1_58 = arith.constant 1 : index
    %c0_59 = arith.constant 0 : index
    %c0_60 = arith.constant 0 : index
    %53 = vector.load %arg2[%c2_57, %c1_58, %c0_59, %c0_60] : memref<3x4x8x16xf32, #tpu.memory_space<vmem>>, vector<1x1x8x16xf32>
    %54 = vector.shape_cast %53 : vector<1x1x8x16xf32> to vector<8x16xf32>
    %cst_61 = arith.constant dense<0.000000e+00> : vector<8x778xf32>
    %55 = tpu.matmul %54, %0, %cst_61 {dimension_numbers = #tpu.dot_dimension_numbers<[1], [0], [0], [1], [0, 0, 1, 1], [], []>} : vector<8x16xf32>, vector<16x778xf32>, vector<8x778xf32> -> vector<8x778xf32>
    %56 = arith.mulf %55, %4 : vector<8x778xf32>
    %57 = arith.addf %52, %56 : vector<8x778xf32>
    %c2_62 = arith.constant 2 : index
    %c2_63 = arith.constant 2 : index
    %c0_64 = arith.constant 0 : index
    %c0_65 = arith.constant 0 : index
    %58 = vector.load %arg2[%c2_62, %c2_63, %c0_64, %c0_65] : memref<3x4x8x16xf32, #tpu.memory_space<vmem>>, vector<1x1x8x16xf32>
    %59 = vector.shape_cast %58 : vector<1x1x8x16xf32> to vector<8x16xf32>
    %cst_66 = arith.constant dense<0.000000e+00> : vector<8x778xf32>
    %60 = tpu.matmul %59, %0, %cst_66 {dimension_numbers = #tpu.dot_dimension_numbers<[1], [0], [0], [1], [0, 0, 1, 1], [], []>} : vector<8x16xf32>, vector<16x778xf32>, vector<8x778xf32> -> vector<8x778xf32>
    %61 = arith.mulf %60, %6 : vector<8x778xf32>
    %62 = arith.addf %57, %61 : vector<8x778xf32>
    %c2_67 = arith.constant 2 : index
    %c3_68 = arith.constant 3 : index
    %c0_69 = arith.constant 0 : index
    %c0_70 = arith.constant 0 : index
    %63 = vector.load %arg2[%c2_67, %c3_68, %c0_69, %c0_70] : memref<3x4x8x16xf32, #tpu.memory_space<vmem>>, vector<1x1x8x16xf32>
    %64 = vector.shape_cast %63 : vector<1x1x8x16xf32> to vector<8x16xf32>
    %cst_71 = arith.constant dense<0.000000e+00> : vector<8x778xf32>
    %65 = tpu.matmul %64, %0, %cst_71 {dimension_numbers = #tpu.dot_dimension_numbers<[1], [0], [0], [1], [0, 0, 1, 1], [], []>} : vector<8x16xf32>, vector<16x778xf32>, vector<8x778xf32> -> vector<8x778xf32>
    %66 = arith.addf %62, %65 : vector<8x778xf32>
    %c2_72 = arith.constant 2 : index
    %c0_73 = arith.constant 0 : index
    %c0_74 = arith.constant 0 : index
    %67 = vector.load %arg4[%c2_72, %c0_73, %c0_74] : memref<3x8x778xf32, #tpu.memory_space<vmem>>, vector<1x8x778xf32>
    %68 = vector.shape_cast %67 : vector<1x8x778xf32> to vector<8x778xf32>
    %69 = vector.shape_cast %66 : vector<8x778xf32> to vector<1x8x778xf32>
    tpu.vector_store %arg4[%c2_72, %c0_73, %c0_74], %69 {strides = array<i32>} : memref<3x8x778xf32, #tpu.memory_space<vmem>>, vector<1x8x778xf32>,
    return
  }
  func.func @transform_0(%arg0: i32) -> (i32, i32) {
    %c0_i32 = arith.constant 0 : i32
    %c0_i32_0 = arith.constant 0 : i32
    %c0_i32_1 = arith.constant 0 : i32
    return %c0_i32, %c0_i32_0 : i32, i32
  }
  func.func @transform_1(%arg0: i32) -> (i32, i32, i32, i32) {
    %c0_i32 = arith.constant 0 : i32
    %c0_i32_0 = arith.constant 0 : i32
    %c0_i32_1 = arith.constant 0 : i32
    %c0_i32_2 = arith.constant 0 : i32
    return %c0_i32, %c0_i32_0, %arg0, %c0_i32_1 : i32, i32, i32, i32
  }
  func.func @transform_2(%arg0: i32) -> (i32, i32, i32) {
    %c0_i32 = arith.constant 0 : i32
    %c0_i32_0 = arith.constant 0 : i32
    %c0_i32_1 = arith.constant 0 : i32
    return %c0_i32, %arg0, %c0_i32_0 : i32, i32, i32
  }
  func.func @transform_3(%arg0: i32) -> (i32, i32, i32) {
    %c0_i32 = arith.constant 0 : i32
    %c0_i32_0 = arith.constant 0 : i32
    %c0_i32_1 = arith.constant 0 : i32
    return %c0_i32, %arg0, %c0_i32_0 : i32, i32, i32
  }
}

</mosaic_0001>

<bundles_post_ra>
// kernel: forward.1
= control target key start
LH: loop header
LB: loop body
LE: loop exit
PB: predicated region body
PF: predicated region fallthrough
CT: control target
= control target key end

     0   :  { %v4051_v3 = vmov 0.0   ;;  %vm52_vm0 = vcmask 130048   ;;  %v4052_v23 = vmov 0.0|0.0   ;;  %vm4053_vm1 = vmmov 0   ;;  %s4604_s0 = inlined_call_operand.vmem [shape: f32[16,778], index: 0, kind: input, shape index: {}]   ;;  %s4605_s1 = inlined_call_operand.vmem [shape: f32[3,4,8,16], index: 1, kind: input, shape index: {}]   ;;  %s4606_s2 = inlined_call_operand.vmem [shape: f32[3,8,778], index: 2, kind: input, shape index: {}]   ;;  %s4607_s3 = inlined_call_operand.vmem [shape: f32[3,8,778], index: 3, kind: output, shape index: {}]  }
   0x1   :  { %v15_v0 = vld [vmem:[%s4604_s0 + $0x8] sm:$0xff]  ;;  %v22_v1 = vld [vmem:[%s4604_s0 + $0x40] sm:$0xff]  ;;  %v17_v2 = vld [vmem:[%s4604_s0 + $0x18] sm:$0xff]  ;;  %120 = vmatprep.mubr.f32.mxu0 %v4051_v3  ;;  %191 = vmatprep.mubr.f32.mxu1 %v4051_v3  ;;  %vm1251_vm2 = vcmask 80896  }
   0x2   :  { %v4085_v4 = vpack.c.bf16 %v22_v1, %v15_v0  ;;  %v24_v5 = vld [vmem:[%s4604_s0 + $0x50] sm:$0xff]  ;;  %v14_v6 = vld [vmem:[%s4604_s0] sm:$0xff]  ;;  %v21_v7 = vld [vmem:[%s4604_s0 + $0x38] sm:$0xff] }
   0x3   :  { %v4096_v8 = vpack.c.bf16 %v24_v5, %v17_v2  ;;  %v4098_v9 = vpack.c.bf16 %v21_v7, %v14_v6  ;;  %v16_v10 = vld [vmem:[%s4604_s0 + $0x10] sm:$0xff]  ;;  %v23_v11 = vld [vmem:[%s4604_s0 + $0x48] sm:$0xff]  ;;  %v51_v12 = vld [vmem:[%s4605_s1] sm:$0xff] }
   0x4   :  { %3869 = vmatprep.subr.bf16.mxu0 %v4085_v4  ;;  %v4110_v13 = vpack.c.bf16 %v23_v11, %v16_v10  ;;  %v19_v14 = vld [vmem:[%s4604_s0 + $0x28] sm:$0xff]  ;;  %v26_v15 = vld [vmem:[%s4604_s0 + $0x60] sm:$0xff]  ;;  %v25_v18 = vld [vmem:[%s4604_s0 + $0x58] sm:$0xff] }
   0x5   :  { %v18_v16 = vld [vmem:[%s4604_s0 + $0x20] sm:$0xff]  ;;  %3873 = vmatprep.subr.bf16.mxu1 %v4096_v8  ;;  %3871 = vmatpush1.bf16.msra.mxu0 %v4098_v9  ;;  %v4123_v17 = vpack.c.bf16 %v26_v15, %v19_v14  ;;  %v20_v19 = vld [vmem:[%s4604_s0 + $0x30] sm:$0xff]  ;;  %v27_v20 = vld [vmem:[%s4604_s0 + $0x68] sm:$0xff] }
   0x6   :  { %3875 = vmatpush1.bf16.msra.mxu1 %v4110_v13  ;;  %v4135_v21 = vpack.c.bf16 %v25_v18, %v18_v16  ;;  %v4137_v22 = vpack.c.bf16 %v27_v20, %v20_v19  ;;  %v3679_v24 = vld [vmem:[%s4605_s1 + $0x8] sm:$0xff]  ;;  %v3684_v25 = vld [vmem:[%s4605_s1 + $0x10] sm:$0xff]  ;;  %v3689_v26 = vld [vmem:[%s4605_s1 + $0x18] sm:$0xff] }
   0x7   :  { %3877 = vmatprep.subr.bf16.mxu0 %v4123_v17  ;;  %3880 = vmatprep.subr.bf16.mxu1 %v4052_v23  ;;  %v3694_v27 = vld [vmem:[%s4605_s1 + $0x20] sm:$0xff]  ;;  %v3699_v28 = vld [vmem:[%s4605_s1 + $0x28] sm:$0xff]  ;;  %v3704_v29 = vld [vmem:[%s4605_s1 + $0x30] sm:$0xff] }
   0x8   :  { %3675 = vmatmul.mubr.msk.f32.vlgmr.msra.gmra.mrb[0].mxu0 %vm52_vm0, %v51_v12  ;;  %v3709_v30 = vld [vmem:[%s4605_s1 + $0x38] sm:$0xff]  ;;  %v3721_v31 = vld [vmem:[%s4605_s1 + $0x40] sm:$0xff]  ;;  %v3726_v32 = vld [vmem:[%s4605_s1 + $0x48] sm:$0xff] }
   0x9   :  { %3676 = vmatmul.mubr.msk.f32.vlgmr.msra.gmra.mrb[0].mxu1 %vm52_vm0, %v51_v12  ;;  %3879 = vmatpush1.bf16.msra.mxu0 %v4135_v21  ;;  %v3731_v33 = vld [vmem:[%s4605_s1 + $0x50] sm:$0xff]  ;;  %v3736_v34 = vld [vmem:[%s4605_s1 + $0x58] sm:$0xff]  ;;  %v4373_v42 = vld [vmem:[%s4606_s2] sm:$0xff] }
   0xa   :  { %3882 = vmatpush3.bf16.msra.mxu1 %v4137_v22  ;;  %262 = vmatprep.mubr.f32.mxu0 %v4051_v3  ;;  %v4378_v43 = vld [vmem:[%s4606_s2 + $0x8] sm:$0xff]  ;;  %v4383_v45 = vld [vmem:[%s4606_s2 + $0x38] sm:$0xff]  ;;  %v4388_v46 = vld [vmem:[%s4606_s2 + $0x10] sm:$0xff] }
   0xb   :  { %3788 = vmatprep.mubr.msk.f32.mxu1 %vm4053_vm1, %v4051_v3  ;;  %3884 = vmatprep.subr.bf16.mxu0 %v4085_v4  ;;  %v4393_v47 = vld [vmem:[%s4606_s2 + $0x48] sm:$0xff]  ;;  %v4398_v48 = vld [vmem:[%s4606_s2 + $0x40] sm:$0xff]  ;;  %v4403_v49 = vld [vmem:[%s4606_s2 + $0x18] sm:$0xff] }
   0xc   :  { %3677 = vmatmul.mubr.msk.f32.vlgmr.msra.gmra.mrb[2].mxu0 %vm52_vm0, %v51_v12  ;;  %3888 = vmatprep.subr.bf16.mxu1 %v4096_v8  ;;  %v4408_v51 = vld [vmem:[%s4606_s2 + $0x50] sm:$0xff]  ;;  %v4417_v58 = vld [vmem:[%s4606_s2 + $0x20] sm:$0xff]  ;;  %v4422_v59 = vld [vmem:[%s4606_s2 + $0x28] sm:$0xff] }
   0xd   :  { %3789 = vmatmul.mubr.msk.f32.vlgmr.msra.gmra.mrb[2].mxu1 %vm52_vm0, %v51_v12  ;;  %3886 = vmatpush1.bf16.msra.mxu0 %v4098_v9  ;;  %v4429_v63 = vld [vmem:[%s4606_s2 + $0x58] sm:$0xff]  ;;  %v4435_v1 = vld [vmem:[%s4606_s2 + $0x30] sm:$0xff]  ;;  %v4446_v5 = vld [vmem:[%s4606_s2 + $0x60] sm:$0xff] }
   0xe   :  { %3890 = vmatpush1.bf16.msra.mxu1 %v4110_v13  ;;  %415 = vmatprep.mubr.f32.mxu0 %v4051_v3  ;;  %v4457_v19 = vld [vmem:[%s4606_s2 + $0x70] sm:$0xff] }
   0xf   :  { %486 = vmatprep.mubr.f32.mxu1 %v4051_v3  ;;  %3892 = vmatprep.subr.bf16.mxu0 %v4123_v17 }
  0x10   :  { %3680 = vmatmul.mubr.msk.f32.vlgmr.msra.gmra.mrb[4].mxu0 %vm52_vm0, %v3679_v24  ;;  %3895 = vmatprep.subr.bf16.mxu1 %v4052_v23 }
  0x11   :  { %3681 = vmatmul.mubr.msk.f32.vlgmr.msra.gmra.mrb[4].mxu1 %vm52_vm0, %v3679_v24  ;;  %3894 = vmatpush1.bf16.msra.mxu0 %v4135_v21 }
  0x12   :  { %3897 = vmatpush3.bf16.msra.mxu1 %v4137_v22  ;;  %557 = vmatprep.mubr.f32.mxu0 %v4051_v3 }
  0x13   :  { %3795 = vmatprep.mubr.msk.f32.mxu1 %vm4053_vm1, %v4051_v3  ;;  %3899 = vmatprep.subr.bf16.mxu0 %v4085_v4 }
  0x14   :  { %3682 = vmatmul.mubr.msk.f32.vlgmr.msra.gmra.mrb[6].mxu0 %vm52_vm0, %v3679_v24  ;;  %3903 = vmatprep.subr.bf16.mxu1 %v4096_v8 }
  0x15   :  { %3796 = vmatmul.mubr.msk.f32.vlgmr.msra.gmra.mrb[6].mxu1 %vm52_vm0, %v3679_v24  ;;  %3901 = vmatpush1.bf16.msra.mxu0 %v4098_v9 }
  0x16   :  { %3905 = vmatpush1.bf16.msra.mxu1 %v4110_v13  ;;  %717 = vmatprep.mubr.f32.mxu0 %v4051_v3 }
  0x17   :  { %788 = vmatprep.mubr.f32.mxu1 %v4051_v3  ;;  %3907 = vmatprep.subr.bf16.mxu0 %v4123_v17 }
  0x18   :  { %3685 = vmatmul.mubr.msk.f32.vlgmr.msra.gmra.mrb[8].mxu0 %vm52_vm0, %v3684_v25  ;;  %3910 = vmatprep.subr.bf16.mxu1 %v4052_v23 }
  0x19   :  { %3686 = vmatmul.mubr.msk.f32.vlgmr.msra.gmra.mrb[8].mxu1 %vm52_vm0, %v3684_v25  ;;  %3909 = vmatpush1.bf16.msra.mxu0 %v4135_v21 }
  0x1a   :  { %3912 = vmatpush3.bf16.msra.mxu1 %v4137_v22  ;;  %859 = vmatprep.mubr.f32.mxu0 %v4051_v3 }
  0x1b   :  { %3802 = vmatprep.mubr.msk.f32.mxu1 %vm4053_vm1, %v4051_v3  ;;  %3914 = vmatprep.subr.bf16.mxu0 %v4085_v4 }
  0x1c   :  { %3687 = vmatmul.mubr.msk.f32.vlgmr.msra.gmra.mrb[10].mxu0 %vm52_vm0, %v3684_v25  ;;  %3918 = vmatprep.subr.bf16.mxu1 %v4096_v8 }
  0x1d   :  { %3803 = vmatmul.mubr.msk.f32.vlgmr.msra.gmra.mrb[10].mxu1 %vm52_vm0, %v3684_v25  ;;  %3916 = vmatpush1.bf16.msra.mxu0 %v4098_v9 }
  0x1e   :  { %3920 = vmatpush1.bf16.msra.mxu1 %v4110_v13  ;;  %1019 = vmatprep.mubr.f32.mxu0 %v4051_v3 }
  0x1f   :  { %1090 = vmatprep.mubr.f32.mxu1 %v4051_v3  ;;  %3922 = vmatprep.subr.bf16.mxu0 %v4123_v17 }
  0x20   :  { %3690 = vmatmul.mubr.msk.f32.vlgmr.msra.gmra.mrb[12].mxu0 %vm52_vm0, %v3689_v26  ;;  %3925 = vmatprep.subr.bf16.mxu1 %v4052_v23 }
  0x21   :  { %3691 = vmatmul.mubr.msk.f32.vlgmr.msra.gmra.mrb[12].mxu1 %vm52_vm0, %v3689_v26  ;;  %3924 = vmatpush1.bf16.msra.mxu0 %v4135_v21 }
  0x22   :  { %3927 = vmatpush3.bf16.msra.mxu1 %v4137_v22  ;;  %1161 = vmatprep.mubr.f32.mxu0 %v4051_v3 }
  0x23   :  { %3809 = vmatprep.mubr.msk.f32.mxu1 %vm4053_vm1, %v4051_v3  ;;  %3929 = vmatprep.subr.bf16.mxu0 %v4085_v4 }
  0x24   :  { %3692 = vmatmul.mubr.msk.f32.vlgmr.msra.gmra.mrb[14].mxu0 %vm52_vm0, %v3689_v26  ;;  %3933 = vmatprep.subr.bf16.mxu1 %v4096_v8 }
  0x25   :  { %3810 = vmatmul.mubr.msk.f32.vlgmr.msra.gmra.mrb[14].mxu1 %vm52_vm0, %v3689_v26  ;;  %3931 = vmatpush1.bf16.msra.mxu0 %v4098_v9  ;;  %v4472_v26 = vld [vmem:[%s4606_s2 + $0x88] sm:$0xff] }
  0x26   :  { %3935 = vmatpush1.bf16.msra.mxu1 %v4110_v13  ;;  %1322 = vmatprep.mubr.f32.mxu0 %v4051_v3 }
  0x27   :  { %1393 = vmatprep.mubr.f32.mxu1 %v4051_v3  ;;  %3937 = vmatprep.subr.bf16.mxu0 %v4123_v17 }
  0x28   :  { %3695 = vmatmul.mubr.msk.f32.vlgmr.msra.gmra.mrb[16].mxu0 %vm52_vm0, %v3694_v27  ;;  %3940 = vmatprep.subr.bf16.mxu1 %v4052_v23 }
  0x29   :  { %3696 = vmatmul.mubr.msk.f32.vlgmr.msra.gmra.mrb[16].mxu1 %vm52_vm0, %v3694_v27  ;;  %3939 = vmatpush1.bf16.msra.mxu0 %v4135_v21 }
  0x2a   :  { %3942 = vmatpush3.bf16.msra.mxu1 %v4137_v22  ;;  %1464 = vmatprep.mubr.f32.mxu0 %v4051_v3 }
  0x2b   :  { %3816 = vmatprep.mubr.msk.f32.mxu1 %vm4053_vm1, %v4051_v3  ;;  %3944 = vmatprep.subr.bf16.mxu0 %v4085_v4 }
  0x2c   :  { %3697 = vmatmul.mubr.msk.f32.vlgmr.msra.gmra.mrb[18].mxu0 %vm52_vm0, %v3694_v27  ;;  %3948 = vmatprep.subr.bf16.mxu1 %v4096_v8 }
  0x2d   :  { %3817 = vmatmul.mubr.msk.f32.vlgmr.msra.gmra.mrb[18].mxu1 %vm52_vm0, %v3694_v27  ;;  %3946 = vmatpush1.bf16.msra.mxu0 %v4098_v9 }
  0x2e   :  { %3950 = vmatpush1.bf16.msra.mxu1 %v4110_v13  ;;  %1617 = vmatprep.mubr.f32.mxu0 %v4051_v3 }
  0x2f   :  { %1688 = vmatprep.mubr.f32.mxu1 %v4051_v3  ;;  %3952 = vmatprep.subr.bf16.mxu0 %v4123_v17 }
  0x30   :  { %3700 = vmatmul.mubr.msk.f32.vlgmr.msra.gmra.mrb[20].mxu0 %vm52_vm0, %v3699_v28  ;;  %3955 = vmatprep.subr.bf16.mxu1 %v4052_v23 }
  0x31   :  { %3701 = vmatmul.mubr.msk.f32.vlgmr.msra.gmra.mrb[20].mxu1 %vm52_vm0, %v3699_v28  ;;  %3954 = vmatpush1.bf16.msra.mxu0 %v4135_v21 }
  0x32   :  { %3957 = vmatpush3.bf16.msra.mxu1 %v4137_v22  ;;  %1759 = vmatprep.mubr.f32.mxu0 %v4051_v3 }
  0x33   :  { %3823 = vmatprep.mubr.msk.f32.mxu1 %vm4053_vm1, %v4051_v3  ;;  %3959 = vmatprep.subr.bf16.mxu0 %v4085_v4 }
  0x34   :  { %3702 = vmatmul.mubr.msk.f32.vlgmr.msra.gmra.mrb[22].mxu0 %vm52_vm0, %v3699_v28  ;;  %3963 = vmatprep.subr.bf16.mxu1 %v4096_v8 }
  0x35   :  { %3824 = vmatmul.mubr.msk.f32.vlgmr.msra.gmra.mrb[22].mxu1 %vm52_vm0, %v3699_v28  ;;  %3961 = vmatpush1.bf16.msra.mxu0 %v4098_v9 }
  0x36   :  { %3965 = vmatpush1.bf16.msra.mxu1 %v4110_v13  ;;  %1919 = vmatprep.mubr.f32.mxu0 %v4051_v3 }
  0x37   :  { %1990 = vmatprep.mubr.f32.mxu1 %v4051_v3  ;;  %3967 = vmatprep.subr.bf16.mxu0 %v4123_v17 }
  0x38   :  { %3705 = vmatmul.mubr.msk.f32.vlgmr.msra.gmra.mrb[24].mxu0 %vm52_vm0, %v3704_v29  ;;  %3970 = vmatprep.subr.bf16.mxu1 %v4052_v23 }
  0x39   :  { %3706 = vmatmul.mubr.msk.f32.vlgmr.msra.gmra.mrb[24].mxu1 %vm52_vm0, %v3704_v29  ;;  %3969 = vmatpush1.bf16.msra.mxu0 %v4135_v21 }
  0x3a   :  { %3972 = vmatpush3.bf16.msra.mxu1 %v4137_v22  ;;  %2061 = vmatprep.mubr.f32.mxu0 %v4051_v3 }
  0x3b   :  { %3830 = vmatprep.mubr.msk.f32.mxu1 %vm4053_vm1, %v4051_v3  ;;  %3974 = vmatprep.subr.bf16.mxu0 %v4085_v4 }
  0x3c   :  { %3707 = vmatmul.mubr.msk.f32.vlgmr.msra.gmra.mrb[26].mxu0 %vm52_vm0, %v3704_v29  ;;  %3978 = vmatprep.subr.bf16.mxu1 %v4096_v8 }
  0x3d   :  { %3831 = vmatmul.mubr.msk.f32.vlgmr.msra.gmra.mrb[26].mxu1 %vm52_vm0, %v3704_v29  ;;  %3976 = vmatpush1.bf16.msra.mxu0 %v4098_v9 }
  0x3e   :  { %3980 = vmatpush1.bf16.msra.mxu1 %v4110_v13  ;;  %2221 = vmatprep.mubr.f32.mxu0 %v4051_v3 }
  0x3f   :  { %2292 = vmatprep.mubr.f32.mxu1 %v4051_v3  ;;  %3982 = vmatprep.subr.bf16.mxu0 %v4123_v17 }
  0x40   :  { %3710 = vmatmul.mubr.msk.f32.vlgmr.msra.gmra.mrb[28].mxu0 %vm52_vm0, %v3709_v30  ;;  %3985 = vmatprep.subr.bf16.mxu1 %v4052_v23 }
  0x41   :  { %3711 = vmatmul.mubr.msk.f32.vlgmr.msra.gmra.mrb[28].mxu1 %vm52_vm0, %v3709_v30  ;;  %3984 = vmatpush1.bf16.msra.mxu0 %v4135_v21 }
  0x42   :  { %3987 = vmatpush3.bf16.msra.mxu1 %v4137_v22  ;;  %2363 = vmatprep.mubr.f32.mxu0 %v4051_v3 }
  0x43   :  { %3837 = vmatprep.mubr.msk.f32.mxu1 %vm4053_vm1, %v4051_v3  ;;  %3989 = vmatprep.subr.bf16.mxu0 %v4085_v4 }
  0x44   :  { %3712 = vmatmul.mubr.msk.f32.vlgmr.msra.gmra.mrb[30].mxu0 %vm52_vm0, %v3709_v30  ;;  %3993 = vmatprep.subr.bf16.mxu1 %v4096_v8 }
  0x45   :  { %3838 = vmatmul.mubr.msk.f32.vlgmr.msra.gmra.mrb[30].mxu1 %vm52_vm0, %v3709_v30  ;;  %3991 = vmatpush1.bf16.msra.mxu0 %v4098_v9 }
  0x46   :  { %3995 = vmatpush1.bf16.msra.mxu1 %v4110_v13  ;;  %2524 = vmatprep.mubr.f32.mxu0 %v4051_v3 }
  0x47   :  { %2595 = vmatprep.mubr.f32.mxu1 %v4051_v3  ;;  %3997 = vmatprep.subr.bf16.mxu0 %v4123_v17 }
  0x48   :  { %3722 = vmatmul.mubr.msk.f32.vlgmr.msra.gmra.mrb[32].mxu0 %vm52_vm0, %v3721_v31  ;;  %4000 = vmatprep.subr.bf16.mxu1 %v4052_v23 }
  0x49   :  { %3723 = vmatmul.mubr.msk.f32.vlgmr.msra.gmra.mrb[32].mxu1 %vm52_vm0, %v3721_v31  ;;  %3999 = vmatpush1.bf16.msra.mxu0 %v4135_v21 }
  0x4a   :  { %4002 = vmatpush3.bf16.msra.mxu1 %v4137_v22  ;;  %2666 = vmatprep.mubr.f32.mxu0 %v4051_v3 }
  0x4b   :  { %3844 = vmatprep.mubr.msk.f32.mxu1 %vm4053_vm1, %v4051_v3  ;;  %4004 = vmatprep.subr.bf16.mxu0 %v4085_v4 }
  0x4c   :  { %3724 = vmatmul.mubr.msk.f32.vlgmr.msra.gmra.mrb[34].mxu0 %vm52_vm0, %v3721_v31  ;;  %4008 = vmatprep.subr.bf16.mxu1 %v4096_v8 }
  0x4d   :  { %3845 = vmatmul.mubr.msk.f32.vlgmr.msra.gmra.mrb[34].mxu1 %vm52_vm0, %v3721_v31  ;;  %4006 = vmatpush1.bf16.msra.mxu0 %v4098_v9 }
  0x4e   :  { %4010 = vmatpush1.bf16.msra.mxu1 %v4110_v13  ;;  %2819 = vmatprep.mubr.f32.mxu0 %v4051_v3 }
  0x4f   :  { %2890 = vmatprep.mubr.f32.mxu1 %v4051_v3  ;;  %4012 = vmatprep.subr.bf16.mxu0 %v4123_v17 }
  0x50   :  { %3727 = vmatmul.mubr.msk.f32.vlgmr.msra.gmra.mrb[36].mxu0 %vm52_vm0, %v3726_v32  ;;  %4015 = vmatprep.subr.bf16.mxu1 %v4052_v23 }
  0x51   :  { %3728 = vmatmul.mubr.msk.f32.vlgmr.msra.gmra.mrb[36].mxu1 %vm52_vm0, %v3726_v32  ;;  %4014 = vmatpush1.bf16.msra.mxu0 %v4135_v21 }
  0x52   :  { %4017 = vmatpush3.bf16.msra.mxu1 %v4137_v22  ;;  %2961 = vmatprep.mubr.f32.mxu0 %v4051_v3 }
  0x53   :  { %3851 = vmatprep.mubr.msk.f32.mxu1 %vm4053_vm1, %v4051_v3  ;;  %4019 = vmatprep.subr.bf16.mxu0 %v4085_v4 }
  0x54   :  { %3729 = vmatmul.mubr.msk.f32.vlgmr.msra.gmra.mrb[38].mxu0 %vm52_vm0, %v3726_v32  ;;  %4023 = vmatprep.subr.bf16.mxu1 %v4096_v8 }
  0x55   :  { %3852 = vmatmul.mubr.msk.f32.vlgmr.msra.gmra.mrb[38].mxu1 %vm52_vm0, %v3726_v32  ;;  %4021 = vmatpush1.bf16.msra.mxu0 %v4098_v9 }
  0x56   :  { %4025 = vmatpush1.bf16.msra.mxu1 %v4110_v13  ;;  %3121 = vmatprep.mubr.f32.mxu0 %v4051_v3 }
  0x57   :  { %3192 = vmatprep.mubr.f32.mxu1 %v4051_v3  ;;  %4027 = vmatprep.subr.bf16.mxu0 %v4123_v17 }
  0x58   :  { %3732 = vmatmul.mubr.msk.f32.vlgmr.msra.gmra.mrb[40].mxu0 %vm52_vm0, %v3731_v33  ;;  %4030 = vmatprep.subr.bf16.mxu1 %v4052_v23 }
  0x59   :  { %3733 = vmatmul.mubr.msk.f32.vlgmr.msra.gmra.mrb[40].mxu1 %vm52_vm0, %v3731_v33  ;;  %4029 = vmatpush1.bf16.msra.mxu0 %v4135_v21 }
  0x5a   :  { %4032 = vmatpush3.bf16.msra.mxu1 %v4137_v22  ;;  %3263 = vmatprep.mubr.f32.mxu0 %v4051_v3 }
  0x5b   :  { %3858 = vmatprep.mubr.msk.f32.mxu1 %vm4053_vm1, %v4051_v3  ;;  %4034 = vmatprep.subr.bf16.mxu0 %v4085_v4  ;;  %v4441_v4 = vld [vmem:[%s4606_s2 + $0x68] sm:$0xff] }
  0x5c   :  { %3734 = vmatmul.mubr.msk.f32.vlgmr.msra.gmra.mrb[42].mxu0 %vm52_vm0, %v3731_v33  ;;  %4038 = vmatprep.subr.bf16.mxu1 %v4096_v8 }
  0x5d   :  { %3859 = vmatmul.mubr.msk.f32.vlgmr.msra.gmra.mrb[42].mxu1 %vm52_vm0, %v3731_v33  ;;  %4036 = vmatpush1.bf16.msra.mxu0 %v4098_v9  ;;  %v4480_v33 = vld [vmem:[%s4606_s2 + $0x90] sm:$0xff] }
  0x5e   :  { %4040 = vmatpush1.bf16.msra.mxu1 %v4110_v13  ;;  %3423 = vmatprep.mubr.f32.mxu0 %v4051_v3 }
  0x5f   :  { %3494 = vmatprep.mubr.f32.mxu1 %v4051_v3  ;;  %4042 = vmatprep.subr.bf16.mxu0 %v4123_v17 }
  0x60   :  { %3737 = vmatmul.mubr.msk.f32.vlgmr.msra.gmra.mrb[44].mxu0 %vm52_vm0, %v3736_v34  ;;  %4045 = vmatprep.subr.bf16.mxu1 %v4052_v23 }
  0x61   :  { %3738 = vmatmul.mubr.msk.f32.vlgmr.msra.gmra.mrb[44].mxu1 %vm52_vm0, %v3736_v34  ;;  %4044 = vmatpush1.bf16.msra.mxu0 %v4135_v21  ;;  %v4462_v21 = vld [vmem:[%s4606_s2 + $0x80] sm:$0xff] }
  0x62   :  { %4047 = vmatpush3.bf16.msra.mxu1 %v4137_v22  ;;  %3565 = vmatprep.mubr.f32.mxu0 %v4051_v3  ;;  %v4467_v22 = vld [vmem:[%s4606_s2 + $0x78] sm:$0xff] }
  0x63   :  { %3865 = vmatprep.mubr.msk.f32.mxu1 %vm4053_vm1, %v4051_v3 }
  0x64   :  { %3739 = vmatmul.mubr.msk.f32.vlgmr.msra.gmra.mrb[46].mxu0 %vm52_vm0, %v3736_v34 }
  0x65   :  { %3866 = vmatmul.mubr.msk.f32.vlgmr.msra.gmra.mrb[46].mxu1 %vm52_vm0, %v3736_v34 }
  0xdb   :  { %v122_v35 = vpop.f32.mrb[0].mxu0 }
  0xdc   :  { %v124_v36 = vpop.f32.mrb[1].mxu0  ;;  %v193_v37 = vpop.f32.mrb[0].mxu1  ;;  %v339_v52 = vmul.f32 %v122_v35, %v4373_v42  ;;  %v4486_v35 = vld [vmem:[%s4606_s2 + $0xa0] sm:$0xff] }
  0xdd   :  { %v195_v38 = vpop.f32.mrb[1].mxu1  ;;  %v340_v56 = vmul.f32 %v124_v36, %v4378_v43  ;;  %v341_v57 = vmul.f32 %v193_v37, %v4388_v46  ;;  %v4491_v36 = vld [vmem:[%s4606_s2 + $0x98] sm:$0xff] }
  0xde   :  { %v342_v0 = vmul.f32 %v195_v38, %v4403_v49 }
  0xdf   :  { %v264_v39 = vpop.f32.mrb[2].mxu0 }
  0xe0   :  { %v266_v40 = vpop.f32.mrb[3].mxu0  ;;  %v335_v41 = vpop.f32.mrb[2].mxu1  ;;  %v343_v9 = vmul.f32 %v264_v39, %v4417_v58 }
  0xe1   :  { %v3790_v44 = vpop.f32.mrb[3].mxu1  ;;  %v344_v14 = vmul.f32 %v266_v40, %v4422_v59  ;;  %v345_v15 = vmul.f32 %v335_v41, %v4435_v1 }
  0xe3   :  { %v417_v50 = vpop.f32.mrb[4].mxu0 }
  0xe4   :  { %v634_v53 = vmul.f32 %v4383_v45, %v417_v50  ;;  %v488_v54 = vpop.f32.mrb[4].mxu1  ;;  %v419_v55 = vpop.f32.mrb[5].mxu0 }
  0xe5   :  { %v636_v60 = vmul.f32 %v4393_v47, %v488_v54  ;;  %v635_v61 = vmul.f32 %v4398_v48, %v419_v55  ;;  %v490_v62 = vpop.f32.mrb[5].mxu1 }
  0xe6   :  { %v641_v2 = vadd.f32 %v634_v53, %v339_v52  ;;  %v637_v3 = vmul.f32 %v4408_v51, %v490_v62 }
  0xe7   :  { %v643_v6 = vadd.f32 %v636_v60, %v341_v57  ;;  %v642_v7 = vadd.f32 %v635_v61, %v340_v56  ;;  %v559_v8 = vpop.f32.mrb[6].mxu0 }
  0xe8   :  { %v644_v10 = vadd.f32 %v637_v3, %v342_v0  ;;  %v638_v11 = vmul.f32 %v4429_v63, %v559_v8  ;;  %v630_v12 = vpop.f32.mrb[6].mxu1  ;;  %v561_v13 = vpop.f32.mrb[7].mxu0 }
  0xe9   :  { %v640_v16 = vmul.f32 %v4441_v4, %v630_v12  ;;  %v639_v17 = vmul.f32 %v4446_v5, %v561_v13  ;;  %v3797_v18 = vpop.f32.mrb[7].mxu1 }
  0xea   :  { %v645_v20 = vadd.f32 %v638_v11, %v343_v9 }
  0xeb   :  { %v647_v23 = vadd.f32 %v640_v16, %v345_v15  ;;  %v646_v24 = vadd.f32 %v639_v17, %v344_v14  ;;  %v719_v25 = vpop.f32.mrb[8].mxu0 }
  0xec   :  { %v936_v27 = vmul.f32 %v4457_v19, %v719_v25  ;;  %v790_v28 = vpop.f32.mrb[8].mxu1  ;;  %v721_v29 = vpop.f32.mrb[9].mxu0 }
  0xed   :  { %v938_v30 = vmul.f32 %v4462_v21, %v790_v28  ;;  %v937_v31 = vmul.f32 %v4467_v22, %v721_v29  ;;  %v792_v32 = vpop.f32.mrb[9].mxu1 }
  0xee   :  { %v939_v34 = vmul.f32 %v4472_v26, %v792_v32  ;;  %v943_v37 = vadd.f32 %v936_v27, %v641_v2 }
  0xef   :  { %v861_v38 = vpop.f32.mrb[10].mxu0  ;;  %v945_v39 = vadd.f32 %v938_v30, %v643_v6  ;;  %v944_v40 = vadd.f32 %v937_v31, %v642_v7 }
  0xf0   :  { %v940_v41 = vmul.f32 %v4480_v33, %v861_v38  ;;  %v932_v44 = vpop.f32.mrb[10].mxu1  ;;  %v863_v50 = vpop.f32.mrb[11].mxu0  ;;  %v946_v52 = vadd.f32 %v939_v34, %v644_v10 }
  0xf1   :  { %v942_v53 = vmul.f32 %v4486_v35, %v932_v44  ;;  %v941_v54 = vmul.f32 %v4491_v36, %v863_v50  ;;  %v3804_v55 = vpop.f32.mrb[11].mxu1 }
  0xf2   :  { %v947_v56 = vadd.f32 %v940_v41, %v645_v20 }
  0xf3   :  { %v1021_v57 = vpop.f32.mrb[12].mxu0  ;;  %v949_v60 = vadd.f32 %v942_v53, %v647_v23  ;;  %v948_v61 = vadd.f32 %v941_v54, %v646_v24 }
  0xf4   :  { %v1238_v62 = vadd.f32 %v1021_v57, %v943_v37  ;;  %v1092_v0 = vpop.f32.mrb[12].mxu1  ;;  %v1023_v2 = vpop.f32.mrb[13].mxu0 }
  0xf5   :  { %v1240_v3 = vadd.f32 %v1092_v0, %v945_v39  ;;  %v1239_v6 = vadd.f32 %v1023_v2, %v944_v40  ;;  %v1094_v7 = vpop.f32.mrb[13].mxu1 }
  0xf6   :  { %1245 = vst [vmem:[%s4607_s3] sm:$0xff] %v1238_v62  ;;  %v1241_v8 = vadd.f32 %v1094_v7, %v946_v52 }
  0xf7   :  { %1247 = vst [vmem:[%s4607_s3 + $0x10] sm:$0xff] %v1240_v3  ;;  %1246 = vst [vmem:[%s4607_s3 + $0x8] sm:$0xff] %v1239_v6  ;;  %v1163_v9 = vpop.f32.mrb[14].mxu0 }
  0xf8   :  { %1248 = vst [vmem:[%s4607_s3 + $0x18] sm:$0xff] %v1241_v8  ;;  %v1242_v10 = vadd.f32 %v1163_v9, %v947_v56  ;;  %v1234_v11 = vpop.f32.mrb[14].mxu1  ;;  %v1165_v12 = vpop.f32.mrb[15].mxu0 }
  0xf9   :  { %v1244_v13 = vadd.f32 %v1234_v11, %v949_v60  ;;  %v1243_v14 = vadd.f32 %v1165_v12, %v948_v61  ;;  %v3811_v15 = vpop.f32.mrb[15].mxu1 }
  0xfa   :  { %1249 = vst [vmem:[%s4607_s3 + $0x20] sm:$0xff] %v1242_v10 }
  0xfb   :  { %1252 = vst.msk [vmem:[%s4607_s3 + $0x30] sm:$0xff] %vm1251_vm2, %v1244_v13  ;;  %1250 = vst [vmem:[%s4607_s3 + $0x28] sm:$0xff] %v1243_v14  ;;  %v1324_v16 = vpop.f32.mrb[16].mxu0 }
  0xfc   :  { %v1326_v17 = vpop.f32.mrb[17].mxu0  ;;  %v1395_v18 = vpop.f32.mrb[16].mxu1  ;;  %v1541_v29 = vmul.f32 %v1324_v16, %v4373_v42 }
  0xfd   :  { %v1397_v20 = vpop.f32.mrb[17].mxu1  ;;  %v1542_v34 = vmul.f32 %v1326_v17, %v4378_v43  ;;  %v1543_v37 = vmul.f32 %v1395_v18, %v4388_v46 }
  0xfe   :  { %v1544_v41 = vmul.f32 %v1397_v20, %v4403_v49 }
  0xff   :  { %v1466_v23 = vpop.f32.mrb[18].mxu0 }
 0x100   :  { %v1468_v24 = vpop.f32.mrb[19].mxu0  ;;  %v1537_v25 = vpop.f32.mrb[18].mxu1  ;;  %v1545_v55 = vmul.f32 %v1466_v23, %v4417_v58 }
 0x101   :  { %v3818_v27 = vpop.f32.mrb[19].mxu1  ;;  %v1546_v62 = vmul.f32 %v1468_v24, %v4422_v59  ;;  %v1547_v0 = vmul.f32 %v1537_v25, %v4435_v1 }
 0x103   :  { %v1619_v28 = vpop.f32.mrb[20].mxu0 }
 0x104   :  { %v1836_v30 = vmul.f32 %v4383_v45, %v1619_v28  ;;  %v1690_v31 = vpop.f32.mrb[20].mxu1  ;;  %v1621_v32 = vpop.f32.mrb[21].mxu0 }
 0x105   :  { %v1838_v38 = vmul.f32 %v4393_v47, %v1690_v31  ;;  %v1837_v39 = vmul.f32 %v4398_v48, %v1621_v32  ;;  %v1692_v40 = vpop.f32.mrb[21].mxu1 }
 0x106   :  { %v1843_v44 = vadd.f32 %v1836_v30, %v1541_v29  ;;  %v1839_v50 = vmul.f32 %v4408_v51, %v1692_v40 }
 0x107   :  { %v1845_v52 = vadd.f32 %v1838_v38, %v1543_v37  ;;  %v1844_v53 = vadd.f32 %v1837_v39, %v1542_v34  ;;  %v1761_v54 = vpop.f32.mrb[22].mxu0 }
 0x108   :  { %v1846_v56 = vadd.f32 %v1839_v50, %v1544_v41  ;;  %v1840_v57 = vmul.f32 %v4429_v63, %v1761_v54  ;;  %v1832_v60 = vpop.f32.mrb[22].mxu1  ;;  %v1763_v61 = vpop.f32.mrb[23].mxu0 }
 0x109   :  { %v1842_v2 = vmul.f32 %v4441_v4, %v1832_v60  ;;  %v1841_v3 = vmul.f32 %v4446_v5, %v1763_v61  ;;  %v3825_v6 = vpop.f32.mrb[23].mxu1 }
 0x10a   :  { %v1847_v7 = vadd.f32 %v1840_v57, %v1545_v55 }
 0x10b   :  { %v1849_v8 = vadd.f32 %v1842_v2, %v1547_v0  ;;  %v1848_v9 = vadd.f32 %v1841_v3, %v1546_v62  ;;  %v1921_v10 = vpop.f32.mrb[24].mxu0 }
 0x10c   :  { %v2138_v11 = vmul.f32 %v4457_v19, %v1921_v10  ;;  %v1992_v12 = vpop.f32.mrb[24].mxu1  ;;  %v1923_v13 = vpop.f32.mrb[25].mxu0 }
 0x10d   :  { %v2140_v14 = vmul.f32 %v4462_v21, %v1992_v12  ;;  %v2139_v15 = vmul.f32 %v4467_v22, %v1923_v13  ;;  %v1994_v16 = vpop.f32.mrb[25].mxu1 }
 0x10e   :  { %v2141_v17 = vmul.f32 %v4472_v26, %v1994_v16  ;;  %v2145_v18 = vadd.f32 %v2138_v11, %v1843_v44 }
 0x10f   :  { %v2063_v20 = vpop.f32.mrb[26].mxu0  ;;  %v2147_v23 = vadd.f32 %v2140_v14, %v1845_v52  ;;  %v2146_v24 = vadd.f32 %v2139_v15, %v1844_v53 }
 0x110   :  { %v2142_v25 = vmul.f32 %v4480_v33, %v2063_v20  ;;  %v2134_v27 = vpop.f32.mrb[26].mxu1  ;;  %v2065_v28 = vpop.f32.mrb[27].mxu0  ;;  %v2148_v29 = vadd.f32 %v2141_v17, %v1846_v56 }
 0x111   :  { %v2144_v30 = vmul.f32 %v4486_v35, %v2134_v27  ;;  %v2143_v31 = vmul.f32 %v4491_v36, %v2065_v28  ;;  %v3832_v32 = vpop.f32.mrb[27].mxu1 }
 0x112   :  { %v2149_v34 = vadd.f32 %v2142_v25, %v1847_v7 }
 0x113   :  { %v2223_v37 = vpop.f32.mrb[28].mxu0  ;;  %v2151_v38 = vadd.f32 %v2144_v30, %v1849_v8  ;;  %v2150_v39 = vadd.f32 %v2143_v31, %v1848_v9 }
 0x114   :  { %v2440_v40 = vadd.f32 %v2223_v37, %v2145_v18  ;;  %v2294_v41 = vpop.f32.mrb[28].mxu1  ;;  %v2225_v44 = vpop.f32.mrb[29].mxu0 }
 0x115   :  { %v2442_v50 = vadd.f32 %v2294_v41, %v2147_v23  ;;  %v2441_v52 = vadd.f32 %v2225_v44, %v2146_v24  ;;  %v2296_v53 = vpop.f32.mrb[29].mxu1 }
 0x116   :  { %3714 = vst [vmem:[%s4607_s3 + $0x38] sm:$0xff] %v2440_v40  ;;  %v2443_v54 = vadd.f32 %v2296_v53, %v2148_v29 }
 0x117   :  { %3716 = vst [vmem:[%s4607_s3 + $0x48] sm:$0xff] %v2442_v50  ;;  %3715 = vst [vmem:[%s4607_s3 + $0x40] sm:$0xff] %v2441_v52  ;;  %v2365_v55 = vpop.f32.mrb[30].mxu0 }
 0x118   :  { %3717 = vst [vmem:[%s4607_s3 + $0x50] sm:$0xff] %v2443_v54  ;;  %v2444_v56 = vadd.f32 %v2365_v55, %v2149_v34  ;;  %v2436_v57 = vpop.f32.mrb[30].mxu1  ;;  %v2367_v60 = vpop.f32.mrb[31].mxu0 }
 0x119   :  { %v2446_v61 = vadd.f32 %v2436_v57, %v2151_v38  ;;  %v2445_v62 = vadd.f32 %v2367_v60, %v2150_v39  ;;  %v3839_v0 = vpop.f32.mrb[31].mxu1 }
 0x11a   :  { %3718 = vst [vmem:[%s4607_s3 + $0x58] sm:$0xff] %v2444_v56 }
 0x11b   :  { %3720 = vst.msk [vmem:[%s4607_s3 + $0x68] sm:$0xff] %vm1251_vm2, %v2446_v61  ;;  %3719 = vst [vmem:[%s4607_s3 + $0x60] sm:$0xff] %v2445_v62  ;;  %v2526_v2 = vpop.f32.mrb[32].mxu0 }
 0x11c   :  { %v2743_v3 = vmul.f32 %v2526_v2, %v4373_v42  ;;  %v2528_v6 = vpop.f32.mrb[33].mxu0  ;;  %v2597_v7 = vpop.f32.mrb[32].mxu1 }
 0x11d   :  { %v2744_v8 = vmul.f32 %v2528_v6, %v4378_v43  ;;  %v2745_v9 = vmul.f32 %v2597_v7, %v4388_v46  ;;  %v2599_v10 = vpop.f32.mrb[33].mxu1 }
 0x11e   :  { %v2746_v11 = vmul.f32 %v2599_v10, %v4403_v49 }
 0x11f   :  { %v2668_v12 = vpop.f32.mrb[34].mxu0 }
 0x120   :  { %v2747_v13 = vmul.f32 %v2668_v12, %v4417_v58  ;;  %v2670_v14 = vpop.f32.mrb[35].mxu0  ;;  %v2739_v15 = vpop.f32.mrb[34].mxu1 }
 0x121   :  { %v2748_v16 = vmul.f32 %v2670_v14, %v4422_v59  ;;  %v2749_v17 = vmul.f32 %v2739_v15, %v4435_v1  ;;  %v3846_v18 = vpop.f32.mrb[35].mxu1 }
 0x123   :  { %v2821_v42 = vpop.f32.mrb[36].mxu0 }
 0x124   :  { %v3038_v20 = vmul.f32 %v4383_v45, %v2821_v42  ;;  %v2892_v23 = vpop.f32.mrb[36].mxu1  ;;  %v2823_v43 = vpop.f32.mrb[37].mxu0 }
 0x125   :  { %v3040_v46 = vmul.f32 %v4393_v47, %v2892_v23  ;;  %v3039_v24 = vmul.f32 %v4398_v48, %v2823_v43  ;;  %v2894_v49 = vpop.f32.mrb[37].mxu1 }
 0x126   :  { %v3045_v25 = vadd.f32 %v3038_v20, %v2743_v3  ;;  %v3041_v58 = vmul.f32 %v4408_v51, %v2894_v49 }
 0x127   :  { %v3047_v27 = vadd.f32 %v3040_v46, %v2745_v9  ;;  %v3046_v28 = vadd.f32 %v3039_v24, %v2744_v8  ;;  %v2963_v29 = vpop.f32.mrb[38].mxu0 }
 0x128   :  { %v3048_v59 = vadd.f32 %v3041_v58, %v2746_v11  ;;  %v3042_v1 = vmul.f32 %v4429_v63, %v2963_v29  ;;  %v3034_v30 = vpop.f32.mrb[38].mxu1  ;;  %v2965_v31 = vpop.f32.mrb[39].mxu0 }
 0x129   :  { %v3044_v45 = vmul.f32 %v4441_v4, %v3034_v30  ;;  %v3043_v32 = vmul.f32 %v4446_v5, %v2965_v31  ;;  %v3853_v34 = vpop.f32.mrb[39].mxu1 }
 0x12a   :  { %v3049_v47 = vadd.f32 %v3042_v1, %v2747_v13 }
 0x12b   :  { %v3051_v37 = vadd.f32 %v3044_v45, %v2749_v17  ;;  %v3050_v48 = vadd.f32 %v3043_v32, %v2748_v16  ;;  %v3123_v38 = vpop.f32.mrb[40].mxu0 }
 0x12c   :  { %v3340_v39 = vmul.f32 %v4457_v19, %v3123_v38  ;;  %v3194_v51 = vpop.f32.mrb[40].mxu1  ;;  %v3125_v40 = vpop.f32.mrb[41].mxu0 }
 0x12d   :  { %v3342_v41 = vmul.f32 %v4462_v21, %v3194_v51  ;;  %v3341_v44 = vmul.f32 %v4467_v22, %v3125_v40  ;;  %v3196_v63 = vpop.f32.mrb[41].mxu1 }
 0x12e   :  { %v3343_v50 = vmul.f32 %v4472_v26, %v3196_v63  ;;  %v3347_v52 = vadd.f32 %v3340_v39, %v3045_v25 }
 0x12f   :  { %v3265_v4 = vpop.f32.mrb[42].mxu0  ;;  %v3349_v53 = vadd.f32 %v3342_v41, %v3047_v27  ;;  %v3348_v5 = vadd.f32 %v3341_v44, %v3046_v28 }
 0x130   :  { %v3344_v54 = vmul.f32 %v4480_v33, %v3265_v4  ;;  %v3336_v55 = vpop.f32.mrb[42].mxu1  ;;  %v3267_v56 = vpop.f32.mrb[43].mxu0  ;;  %v3350_v57 = vadd.f32 %v3343_v50, %v3048_v59 }
 0x131   :  { %v3346_v19 = vmul.f32 %v4486_v35, %v3336_v55  ;;  %v3345_v60 = vmul.f32 %v4491_v36, %v3267_v56  ;;  %v3860_v61 = vpop.f32.mrb[43].mxu1 }
 0x132   :  { %v3351_v21 = vadd.f32 %v3344_v54, %v3049_v47 }
 0x133   :  { %v3425_v62 = vpop.f32.mrb[44].mxu0  ;;  %v3353_v22 = vadd.f32 %v3346_v19, %v3051_v37  ;;  %v3352_v0 = vadd.f32 %v3345_v60, %v3050_v48 }
 0x134   :  { %v3642_v2 = vadd.f32 %v3425_v62, %v3347_v52  ;;  %v3496_v26 = vpop.f32.mrb[44].mxu1  ;;  %v3427_v3 = vpop.f32.mrb[45].mxu0 }
 0x135   :  { %v3644_v6 = vadd.f32 %v3496_v26, %v3349_v53  ;;  %v3643_v7 = vadd.f32 %v3427_v3, %v3348_v5  ;;  %v3498_v8 = vpop.f32.mrb[45].mxu1 }
 0x136   :  { %3741 = vst [vmem:[%s4607_s3 + $0x70] sm:$0xff] %v3642_v2  ;;  %v3645_v33 = vadd.f32 %v3498_v8, %v3350_v57 }
 0x137   :  { %3743 = vst [vmem:[%s4607_s3 + $0x80] sm:$0xff] %v3644_v6  ;;  %3742 = vst [vmem:[%s4607_s3 + $0x78] sm:$0xff] %v3643_v7  ;;  %v3567_v35 = vpop.f32.mrb[46].mxu0 }
 0x138   :  { %3744 = vst [vmem:[%s4607_s3 + $0x88] sm:$0xff] %v3645_v33  ;;  %v3646_v36 = vadd.f32 %v3567_v35, %v3351_v21  ;;  %v3638_v9 = vpop.f32.mrb[46].mxu1  ;;  %v3569_v10 = vpop.f32.mrb[47].mxu0 }
 0x139   :  { %v3648_v11 = vadd.f32 %v3638_v9, %v3353_v22  ;;  %v3647_v12 = vadd.f32 %v3569_v10, %v3352_v0  ;;  %v3867_v13 = vpop.f32.mrb[47].mxu1 }
 0x13a   :  { %3745 = vst [vmem:[%s4607_s3 + $0x90] sm:$0xff] %v3646_v36 }
 0x13b   :  { %3747 = vst.msk [vmem:[%s4607_s3 + $0xa0] sm:$0xff] %vm1251_vm2, %v3648_v11  ;;  %3746 = vst [vmem:[%s4607_s3 + $0x98] sm:$0xff] %v3647_v12 }

</bundles_post_ra>
